<compile_context>
chip_gen: v7x
topology: tpu7x:2x2x1
jax: 0.10.0
libtpu: 0.0.40
codegen_flags: <defaults>
</compile_context>

<pallas_src>
import math
from functools import partial

import jax
import jax.numpy as jnp
from jax.experimental import pallas as pl
from jax.experimental.pallas import tpu as pltpu


def _round_up(a: int, m: int) -> int:
    return (a + m - 1) // m * m


# ----------------------------------------------------------------------------
# Path 1: small table resident in VMEM -> one-hot MXU matmul per token block.
# ----------------------------------------------------------------------------
def _embed_onehot_kernel(ids_ref, emb_ref, out_ref, *, scale):
    # ids_ref : (tb, 1) int32 in VMEM (current token block)
    # emb_ref : (V, D)  full embedding table, resident across all grid steps
    # out_ref : (tb, D) output tile
    tb = ids_ref.shape[0]
    v = emb_ref.shape[0]
    onehot = (ids_ref[...] ==
              jax.lax.broadcasted_iota(jnp.int32, (tb, v), 1)).astype(emb_ref.dtype)
    acc = jnp.dot(onehot, emb_ref[...], preferred_element_type=jnp.float32)
    out_ref[...] = (acc * scale).astype(out_ref.dtype)


# ----------------------------------------------------------------------------
# Path 2: large table in HBM -> double-buffered per-row DMA gather.
# ----------------------------------------------------------------------------
def _embed_gather_kernel(ids_ref, emb_hbm, out_ref, rows_vmem, dma_sems, *,
                         scale, token_block):
    # ids_ref   : (N_pad,) int32 in SMEM (scalar-prefetched, pre-clipped ids)
    # emb_hbm   : (V, D) raw HBM ref (never auto-copied to VMEM)
    # out_ref   : (tb, D) output tile
    # rows_vmem : (2, tb, D) double-buffered gather scratch
    # dma_sems  : (2,) DMA semaphores, one per slot
    i = pl.program_id(0)
    nb = pl.num_programs(0)
    cur = i % 2
    nxt = 1 - cur

    def issue_block(block_idx, slot):
        base = block_idx * token_block

        def body(t, carry):
            tok = ids_ref[base + t]          # already clipped in the wrapper
            pltpu.make_async_copy(
                emb_hbm.at[pl.ds(tok, 1), :],
                rows_vmem.at[slot, pl.ds(t, 1), :],
                dma_sems.at[slot],
            ).start()
            return carry

        # Partial unroll lets the scheduler pack SMEM id loads + descriptor
        # pushes per bundle (descriptor issue rate is the scalar bottleneck).
        jax.lax.fori_loop(0, token_block, body, None, unroll=8)

    # Prime the pipeline: block 0 on the very first grid step.
    @pl.when(i == 0)
    def _():
        issue_block(0, 0)

    # Prefetch block i+1 into the other slot BEFORE waiting on block i; its
    # HBM latency hides behind this step's compute and output writeback.
    @pl.when(i + 1 < nb)
    def _():
        issue_block(i + 1, nxt)

    # One aggregate wait retires all token_block row DMAs of the current slot
    # (token_block * D * itemsize bytes on the shared semaphore).
    pltpu.make_async_copy(rows_vmem.at[cur], rows_vmem.at[cur],
                          dma_sems.at[cur]).wait()

    out_ref[...] = (rows_vmem[cur].astype(jnp.float32) * scale).astype(out_ref.dtype)


# ----------------------------------------------------------------------------
# Wrapper
# ----------------------------------------------------------------------------
def input_embeddings(x, embedding, d_model=None, *, token_block=512,
                     force_hbm_gather=False):
    """x: integer token ids (any shape); embedding: (V, D). Returns x.shape + (D,)."""
    v, d = embedding.shape
    if d_model is None:
        d_model = d
    assert d == d_model, "embedding table width must equal d_model"
    scale = float(math.sqrt(d_model))

    orig_shape = x.shape
    n = 1
    for s in orig_shape:
        n *= s

    # Block size: pad N up to a multiple of tb instead of gcd (which could
    # silently degrade to tb=1 and a per-token grid).
    n_r = _round_up(max(n, 1), 8)
    if token_block >= n_r:
        tb = n_r                                  # single block == full extent
    else:
        tb = _round_up(token_block, 128)          # lane/sublane friendly block
    n_pad = _round_up(n, tb)

    # Clamp hoisted out of the kernel (vectorized, fuses with the reshape).
    # Pad with id 0 so padded rows are valid reads; they are sliced away below.
    # NOTE: nn.Embedding would raise on out-of-range ids; we clamp instead.
    ids = jnp.clip(x.reshape(n).astype(jnp.int32), 0, v - 1)
    ids = jnp.pad(ids, (0, n_pad - n))

    table_bytes = v * d * embedding.dtype.itemsize
    use_fast_path = (not force_hbm_gather) and table_bytes <= (8 << 20) and v <= 2048
    # TODO(synk): for medium tables (~24-48 MiB on v5e/v6e, ~12-24 MiB/TC on
    # v7x) a VMEM-resident jnp.take path would beat both; the one-hot MXU fast
    # path is only used for small vocabularies here.

    if use_fast_path:
        out = pl.pallas_call(
            partial(_embed_onehot_kernel, scale=scale),
            out_shape=jax.ShapeDtypeStruct((n_pad, d), embedding.dtype),
            grid=(n_pad // tb,),
            in_specs=[
                pl.BlockSpec((tb, 1), lambda i: (i, 0)),   # ids block (VMEM)
                pl.BlockSpec((v, d), lambda i: (0, 0)),    # full table, resident
            ],
            out_specs=pl.BlockSpec((tb, d), lambda i: (i, 0)),
            compiler_params=pltpu.CompilerParams(
                dimension_semantics=("parallel",),
                vmem_limit_bytes=64 * 1024 * 1024,
            ),
        )(ids.reshape(n_pad, 1), embedding)
    else:
        # TODO(synk): for very long sequences (N >~ 128K tokens) the (N_pad,)
        # scalar-prefetch id array hits the SMEM ceiling; switch ids to blocked
        # SMEM inputs (two blocks per step to keep the i+1 prefetch) then.
        out = pl.pallas_call(
            partial(_embed_gather_kernel, scale=scale, token_block=tb),
            out_shape=jax.ShapeDtypeStruct((n_pad, d), embedding.dtype),
            grid_spec=pltpu.PrefetchScalarGridSpec(
                num_scalar_prefetch=1,                     # ids -> SMEM up front
                grid=(n_pad // tb,),
                in_specs=[
                    pl.BlockSpec(memory_space=pl.ANY),     # table stays in HBM
                ],
                out_specs=pl.BlockSpec((tb, d), lambda i, ids: (i, 0)),
                scratch_shapes=[
                    pltpu.VMEM((2, tb, d), embedding.dtype),  # double-buffered rows
                    pltpu.SemaphoreType.DMA((2,)),            # one sem per slot
                ],
            ),
            compiler_params=pltpu.CompilerParams(
                # Cross-step double-buffering carries scratch state between grid
                # steps, so this axis must stay sequential ("arbitrary").
                # TODO(synk): for v7x 2-TC sharding, split the token range across
                # cores above this call instead of marking the axis parallel.
                dimension_semantics=("arbitrary",),
                vmem_limit_bytes=64 * 1024 * 1024,
            ),
        )(ids, embedding)

    return out[:n].reshape(*orig_shape, d)


if __name__ == "__main__":
    d_model = 32
    vocab_size = 64
    batch, seq = 2, 8

    key = jax.random.PRNGKey(0)
    k_emb, k_ids = jax.random.split(key)

    # nn.Embedding weights are N(0, 1) by default.
    embedding = jax.random.normal(k_emb, (vocab_size, d_model), dtype=jnp.float32)
    x = jax.random.randint(k_ids, (batch, seq), 0, vocab_size, dtype=jnp.int32)

    ref = jnp.take(embedding, x, axis=0) * math.sqrt(d_model)

    # Small table -> VMEM-resident one-hot MXU fast path.
    out_fast = jax.block_until_ready(input_embeddings(x, embedding, d_model))
    assert out_fast.shape == (batch, seq, d_model)
    assert out_fast.dtype == jnp.float32
    assert jnp.allclose(out_fast, ref, atol=1e-5, rtol=1e-5)

    # Force the large-table HBM-gather path (double-buffered row DMAs).
    out_gather = jax.block_until_ready(
        input_embeddings(x, embedding, d_model, force_hbm_gather=True))
    assert out_gather.shape == (batch, seq, d_model)
    assert jnp.allclose(out_gather, ref, atol=1e-5, rtol=1e-5)

    print("KERNEL_OK")
</pallas_src>

<mosaic_0001>
module attributes {stable_mosaic.version = 11 : i64} {
  func.func @_embed_onehot_kernel(%arg0: i32, %arg1: memref<16x1xi32, #tpu.memory_space<vmem>>, %arg2: memref<64x32xf32, #tpu.memory_space<vmem>>, %arg3: memref<16x32xf32, #tpu.memory_space<vmem>>) attributes {dimension_semantics = [#tpu.dimension_semantics<parallel>], iteration_bounds = array<i64: 1>, scalar_prefetch = 0 : i64, scratch_operands = 0 : i64, tpu.core_type = #tpu.core_type<tc>, window_params = [{transform_indices = @transform_0, window_bounds = array<i64: 16, 1>}, {pipeline_mode = #tpu.pipeline_mode<synchronous>, transform_indices = @transform_1, window_bounds = array<i64: 64, 32>}, {transform_indices = @transform_2, window_bounds = array<i64: 16, 32>}]} {
    %c0 = arith.constant 0 : index
    %c0_0 = arith.constant 0 : index
    %0 = vector.load %arg1[%c0, %c0_0] : memref<16x1xi32, #tpu.memory_space<vmem>>, vector<16x1xi32>
    %1 = tpu.iota {dimensions = array<i32: 1>} : vector<16x64xi32>
    %2 = vector.broadcast %0 : vector<16x1xi32> to vector<16x64xi32>
    %3 = arith.cmpi eq, %2, %1 : vector<16x64xi32>
    %4 = arith.extui %3 : vector<16x64xi1> to vector<16x64xi32>
    %5 = arith.sitofp %4 : vector<16x64xi32> to vector<16x64xf32>
    %c0_1 = arith.constant 0 : index
    %c0_2 = arith.constant 0 : index
    %6 = vector.load %arg2[%c0_1, %c0_2] : memref<64x32xf32, #tpu.memory_space<vmem>>, vector<64x32xf32>
    %cst = arith.constant dense<0.000000e+00> : vector<16x32xf32>
    %7 = tpu.matmul %5, %6, %cst {dimension_numbers = #tpu.dot_dimension_numbers<[1], [0], [0], [1], [0, 0, 1, 1], [], []>} : vector<16x64xf32>, vector<64x32xf32>, vector<16x32xf32> -> vector<16x32xf32>
    %cst_3 = arith.constant 5.65685415 : f32
    %8 = vector.broadcast %cst_3 : f32 to vector<16x32xf32>
    %9 = arith.mulf %7, %8 : vector<16x32xf32>
    %c0_4 = arith.constant 0 : index
    %c0_5 = arith.constant 0 : index
    %10 = vector.load %arg3[%c0_4, %c0_5] : memref<16x32xf32, #tpu.memory_space<vmem>>, vector<16x32xf32>
    tpu.vector_store %arg3[%c0_4, %c0_5], %9 {strides = array<i32>} : memref<16x32xf32, #tpu.memory_space<vmem>>, vector<16x32xf32>,
    return
  }
  func.func @transform_0(%arg0: i32) -> (i32, i32) {
    %c0_i32 = arith.constant 0 : i32
    %c0_i32_0 = arith.constant 0 : i32
    return %arg0, %c0_i32 : i32, i32
  }
  func.func @transform_1(%arg0: i32) -> (i32, i32) {
    %c0_i32 = arith.constant 0 : i32
    %c0_i32_0 = arith.constant 0 : i32
    %c0_i32_1 = arith.constant 0 : i32
    return %c0_i32, %c0_i32_0 : i32, i32
  }
  func.func @transform_2(%arg0: i32) -> (i32, i32) {
    %c0_i32 = arith.constant 0 : i32
    %c0_i32_0 = arith.constant 0 : i32
    return %arg0, %c0_i32 : i32, i32
  }
}

</mosaic_0001>

<bundles_post_ra>
// kernel: tpu_custom_call.1
= control target key start
LH: loop header
LB: loop body
LE: loop exit
PB: predicated region body
PF: predicated region fallthrough
CT: control target
= control target key end

     0   :  { %7 = vsyncpa [#allocation3], 0  ;;  %s365_s0 = inlined_call_operand.hbm [shape: s32[16,1], index: 0, kind: input, shape index: {}]   ;;  %s366_s1 = inlined_call_operand.hbm [shape: f32[64,32], index: 1, kind: input, shape index: {}]   ;;  %s367_s2 = inlined_call_operand.hbm [shape: f32[16,32], index: 2, kind: output, shape index: {}]  }
   0x1   :  { %8 = vsyncpa [#allocation6], 0 }
   0x2   :  { %9 = vsyncpa [#allocation4], 0  ;;  %s298_s9 = smov [#allocation2]   ;;  %s226_s13 = scalar_lea.hbm %s365_s0, 256 }
   0x3   :  { %s15_s10 = sshll.u32 %s298_s9, 4  ;;  %p227_p0 = scmp.ne.s32.totalorder %s365_s0, %s226_s13  ;;  %s16_s10 = int_to_ptr.vmem [resolvable:$true] %s15_s10 }
   0x4   :  { %p230_p1 = scmp.lt.u32.totalorder %s226_s13, %s365_s0 }
   0x6   :  { %p232_p2 = pnand %p230_p1, %p227_p0 }
   0x8   :  { %235 = shalt.err (!%p232_p2)
}
   0x9   :  { %s236_s18 = scalar_lea.vmem %s16_s10, 256  ;;  %p241_p4 = scmp.lt.s32.totalorder %s16_s10, %s16_s10 }
   0xa   :  { %p237_p3 = scmp.ne.s32.totalorder %s16_s10, %s236_s18  ;;  %p242_p5 = scmp.lt.s32.totalorder %s236_s18, %s236_s18 }
   0xc   :  { %p243_p6 = por %p242_p5, %p241_p4 }
   0xe   :  { %p244_p7 = pnand %p243_p6, %p237_p3 }
  0x10   :  { %247 = shalt.err (!%p244_p7)
}
  0x11   :  { %s299_s19 = smov 128   ;;  %s300_s20 = smov 8  }
  0x12   :  { %21 = dma.hbm_to_vmem [thread:$0]  %s365_s0, 256, %s16_s10, [#allocation3], %s299_s19, %s299_s19, %s300_s20  }
  0x13   :  { %s301_s23 = smov [#allocation5]   ;;  %s248_s27 = scalar_lea.hbm %s366_s1, 1024 }
  0x14   :  { %s27_s24 = sshll.u32 %s301_s23, 4  ;;  %p249_p8 = scmp.ne.s32.totalorder %s366_s1, %s248_s27  ;;  %s28_s24 = int_to_ptr.vmem [resolvable:$true] %s27_s24 }
  0x15   :  { %p252_p9 = scmp.lt.u32.totalorder %s248_s27, %s366_s1 }
  0x17   :  { %p254_p10 = pnand %p252_p9, %p249_p8 }
  0x19   :  { %257 = shalt.err (!%p254_p10)
}
  0x1a   :  { %s258_s4 = scalar_lea.vmem %s28_s24, 1024  ;;  %p263_p12 = scmp.lt.s32.totalorder %s28_s24, %s28_s24 }
  0x1b   :  { %p259_p11 = scmp.ne.s32.totalorder %s28_s24, %s258_s4  ;;  %p264_p13 = scmp.lt.s32.totalorder %s258_s4, %s258_s4 }
  0x1d   :  { %p265_p0 = por %p264_p13, %p263_p12 }
  0x1f   :  { %p266_p1 = pnand %p265_p0, %p259_p11 }
  0x21   :  { %269 = shalt.err (!%p266_p1)
}
  0x22   :  { %33 = dma.hbm_to_vmem [thread:$0]  %s366_s1, 1024, %s28_s24, [#allocation6], %s299_s19, %s299_s19, %s300_s20  }
  0x23   :  { %292 = dma.done.wait [#allocation3], 256  }
  0x24   :  { %293 = vsyncadd [#allocation3], 4294967040 }
  0x25   :  { %294 = dma.done.wait [#allocation6], 1024  }
  0x26   :  { %295 = vsyncadd [#allocation6], 4294966272  ;;  %v302_v0 = vmov 0   ;;  %v40_v1 = vld [vmem:[#allocation2] sm:$0xff]  ;;  %v56_v2 = vld [vmem:[#allocation5] sm:$0xff]  ;;  %v42_v15 = vlaneseq  ;;  %vm64_vm0 = vcmask 523264  }
  0x27   :  { %225 = vset.pattern.permute.xlu0 %v302_v0  ;;  %v57_v3 = vld [vmem:[#allocation5 + $0x8] sm:$0xff]  ;;  %v58_v4 = vld [vmem:[#allocation5 + $0x10] sm:$0xff]  ;;  %v59_v5 = vld [vmem:[#allocation5 + $0x18] sm:$0xff]  ;;  %v303_v18 = vmov 0.0   ;;  %s304_s1 = smov [#allocation7]   ;;  %vm148_vm3 = vcmask 261120  }
  0x28   :  { %45 = vperm.xlu0 %225, %v40_v1   ;;  %v41_v6 = vld [vmem:[#allocation2 + $0x8] sm:$0xff]  ;;  %v202_v7 = vpack.c.bf16 %v57_v3, %v56_v2  ;;  %v206_v8 = vpack.c.bf16 %v59_v5, %v58_v4  ;;  %v60_v9 = vld [vmem:[#allocation5 + $0x20] sm:$0xff]  ;;  %v61_v10 = vld [vmem:[#allocation5 + $0x28] sm:$0xff]  ;;  %v43_v16 = vand.u32 127, %v42_v15  ;;  %s156_s6 = sshll.u32 %s304_s1, 4  ;;  %s157_s6 = int_to_ptr.vmem [resolvable:$true] %s156_s6 }
  0x29   :  { %v210_v11 = vpack.c.bf16 %v61_v10, %v60_v9  ;;  %v62_v12 = vld [vmem:[#allocation5 + $0x30] sm:$0xff]  ;;  %v63_v13 = vld [vmem:[#allocation5 + $0x38] sm:$0xff]  ;;  %s270_s7 = scalar_lea.vmem %s157_s6, 256  ;;  %p275_p3 = scmp.lt.s32.totalorder %s157_s6, %s157_s6 }
  0x2a   :  { %203 = vmatprep.subr.bf16.mxu0 %v202_v7  ;;  %v214_v14 = vpack.c.bf16 %v63_v13, %v62_v12  ;;  %p271_p2 = scmp.ne.s32.totalorder %s157_s6, %s270_s7  ;;  %p276_p4 = scmp.lt.s32.totalorder %s270_s7, %s270_s7 }
  0x2b   :  { %205 = vmatpush3.bf16.msra.mxu0 %v202_v7 }
  0x2c   :  { %48 = vperm.xlu0 %225, %v41_v6   ;;  %207 = vmatprep.subr.bf16.mxu0 %v206_v8  ;;  %p277_p5 = por %p276_p4, %p275_p3 }
  0x2e   :  { %p278_p6 = pnand %p277_p5, %p271_p2 }
  0x2f   :  { %209 = vmatpush3.bf16.msra.mxu0 %v206_v8 }
  0x30   :  { %211 = vmatprep.subr.bf16.mxu0 %v210_v11 }
  0x33   :  { %213 = vmatpush3.bf16.msra.mxu0 %v210_v11 }
  0x34   :  { %215 = vmatprep.subr.bf16.mxu0 %v214_v14 }
  0x37   :  { %217 = vmatpush3.bf16.msra.mxu0 %v214_v14 }
  0xa7   :  { %v46_v17 = vpop.permute.xlu0 %45 }
  0xa8   :  { %vm50_vm1 = vcmp.eq.s32.totalorder %v46_v17, %v43_v16 }
  0xa9   :  { %v169_v19 = vsel %vm50_vm1, 1.0, %v303_v18 }
  0xaa   :  { %199 = vmatprep.mubr.msk.f32.mxu0 %vm64_vm0, %v169_v19 }
  0xab   :  { %v49_v20 = vpop.permute.xlu0 %48 }
  0xac   :  { %vm51_vm2 = vcmp.eq.s32.totalorder %v49_v20, %v43_v16 }
  0xad   :  { %v170_v21 = vsel %vm51_vm2, 1.0, %v303_v18 }
  0xae   :  { %200 = vmatmul.mubr.msk.f32.vlgmr.msra.gmra.mrb[0].mxu0 %vm64_vm0, %v170_v21 }
 0x181   :  { %v201_v22 = vpop.f32.mrb[0].mxu0 }
 0x182   :  { %v147_v23 = vmul.f32 5.656854, %v201_v22  ;;  %v137_v24 = vpop.f32.mrb[1].mxu0 }
 0x183   :  { %v146_v25 = vmul.f32 5.656854, %v137_v24 }
 0x184   :  { %150 = vst.msk [vmem:[#allocation7 + $0x8] sm:$0xff] %vm148_vm3, %v147_v23 }
 0x185   :  { %149 = vst.msk [vmem:[#allocation7] sm:$0xff] %vm148_vm3, %v146_v25 }
 0x186   :  { %281 = shalt.err (!%p278_p6)
}
 0x187   :  { %s282_s10 = scalar_lea.hbm %s367_s2, 256 }
 0x188   :  { %p283_p7 = scmp.ne.s32.totalorder %s367_s2, %s282_s10  ;;  %p286_p8 = scmp.lt.u32.totalorder %s282_s10, %s367_s2 }
 0x18a   :  { %p288_p9 = pnand %p286_p8, %p283_p7 }
 0x18c   :  { %291 = shalt.err (!%p288_p9)
}
 0x18d   :  { %162 = dma.vmem_to_hbm [thread:$0]  %s157_s6, 256, %s367_s2, [#allocation4], %s299_s19, %s299_s19, %s300_s20  }
 0x18e   :  { %296 = dma.done.wait [#allocation4], 256  }
 0x18f   :  { %297 = vsyncadd [#allocation4], 4294967040 }
 0x190   :  { %166 = vsyncpa [#allocation3], 1 }
 0x191   :  { %167 = vsyncpa [#allocation6], 1 }
 0x192   :  { %168 = vsyncpa [#allocation4], 1 }

</bundles_post_ra>
